<compile_context>
chip_gen: v6e
topology: v6e:2x2x1
jax: 0.10.0
libtpu: 0.0.40
codegen_flags: <defaults>
</compile_context>

<pallas_src>
import functools

import jax
import jax.numpy as jnp
from jax.experimental import pallas as pl
from jax.experimental.pallas import tpu as pltpu


def _round_up(x, m):
    return (x + m - 1) // m * m


def _sublane_multiple(dtype):
    # dtype-dependent minimum sublane tile (f32:8, bf16:16, int8/fp8:32).
    return {1: 32, 2: 16, 4: 8, 8: 8}.get(jnp.dtype(dtype).itemsize, 8)


_X_BLOCK_TARGET = 8 << 20   # aim ~8 MiB per x buffer
_X_BLOCK_MAX = 16 << 20     # hard cap per x buffer (2 bufs -> 32 MiB, v7x-safe)


# ----------------------------- kernels --------------------------------------


def _lr_kernel_single(x_ref, w_ref, b_ref, o_ref):
    # x_ref: (bb, F) VMEM    w_ref: (1, F) VMEM (resident, fetched once)
    # b_ref: (1,)   SMEM     o_ref: (1, 1, bb) lane-dense output row
    # (1, F) . (bb, F)^T -> (1, bb).  Transposed stationary operand (like
    # q @ k.T in flash attention) -> no physical XLU transpose of x.
    y = jax.lax.dot_general(
        w_ref[...],
        x_ref[...],
        dimension_numbers=(((1,), (1,)), ((), ())),
        preferred_element_type=jnp.float32,
    )
    o_ref[0] = (y + b_ref[0]).astype(o_ref.dtype)


def _lr_kernel_multi(x_ref, w_ref, b_ref, o_ref, acc_ref, *, feat, bf, mask_tail):
    # x_ref: (bb, bf)   w_ref: (1, bf)   b_ref: (1,) SMEM
    # o_ref: (1, 1, bb) lane-dense       acc_ref: (1, bb) f32 (persists over K)
    k = pl.program_id(1)

    @pl.when(k == 0)
    def _init():
        acc_ref[...] = jnp.zeros_like(acc_ref)

    x = x_ref[...]
    if mask_tail:
        # Tail feature columns of the last K tile contain stale VMEM (possibly
        # NaN/Inf); zero them so they contribute exactly 0 to the dot.
        col = jax.lax.broadcasted_iota(jnp.int32, x.shape, 1) + k * bf
        x = jnp.where(col < feat, x, jnp.zeros_like(x))

    acc_ref[...] += jax.lax.dot_general(
        w_ref[...],
        x,
        dimension_numbers=(((1,), (1,)), ((), ())),
        preferred_element_type=jnp.float32,
    )

    @pl.when(k == pl.num_programs(1) - 1)
    def _finalize():
        o_ref[0] = (acc_ref[...] + b_ref[0]).astype(o_ref.dtype)


# ----------------------------- wrapper ---------------------------------------


def _choose_tiles(B, F, itemsize, sub):
    """Adaptive (batch, feature) tile sizes targeting ~8 MiB x blocks."""
    Fpad = _round_up(F, 128)
    Bpad = _round_up(B, sub)
    min_rows = max(sub, 128)
    if Fpad * min_rows * itemsize <= _X_BLOCK_MAX:
        bf = F  # whole feature dim in one block -> contiguous DMA, K collapses
    else:
        bf = max(128, (_X_BLOCK_MAX // (min_rows * itemsize)) // 128 * 128)
    bf_phys = _round_up(bf, 128)
    bb = max(sub, _round_up(_X_BLOCK_TARGET // (bf_phys * itemsize), sub))
    bb = min(bb, Bpad)
    # v7x megacore: make sure the "parallel" batch axis has >= 2 tiles when the
    # batch is big enough to be worth splitting across the two TensorCores.
    if bb >= Bpad and Bpad >= 1024:
        bb = _round_up((Bpad + 1) // 2, sub)
    return bb, bf


@functools.partial(jax.jit, static_argnames=("block_b", "block_f", "x_buffers"))
def lr_forward(x, weight, bias, *, block_b=None, block_f=None, x_buffers=2):
    """Linear(feature_num -> 1) forward pass.

    x:      (B, F)
    weight: (1, F)   (PyTorch nn.Linear weight layout)
    bias:   (1,)
    returns (B, 1)
    """
    B, F = x.shape
    out_dtype = x.dtype
    itemsize = jnp.dtype(x.dtype).itemsize
    sub = _sublane_multiple(x.dtype)

    bb, bf = _choose_tiles(B, F, itemsize, sub)
    if block_b is not None:
        bb = min(_round_up(block_b, sub), _round_up(B, sub))
    if block_f is not None:
        bf = F if block_f >= F else max(128, (block_f // 128) * 128)

    # Single-batch-tile case: use the exact extent (whole-array block, no
    # out-of-bounds rows at all).
    if bb >= B:
        bb = B
        n_bt = 1
    else:
        n_bt = pl.cdiv(B, bb)

    single_k = bf >= F
    if single_k:
        bf = F
        n_kt = 1
    else:
        n_kt = pl.cdiv(F, bf)
    Fp = n_kt * bf  # weight padding extent for the multi-K path (tiny pad)

    w_row = weight.reshape(1, F).astype(x.dtype)
    b_smem = bias.reshape(1).astype(jnp.float32)

    # VMEM budget: x multi-buffered, weight block, output (sublane-padded), acc.
    bf_phys = _round_up(bf, 128)
    bb_phys = _round_up(bb, 8)
    est = (x_buffers * bb_phys * bf_phys * itemsize   # x buffers
           + 2 * 8 * bf_phys * itemsize               # weight block buffers
           + 2 * 8 * bb_phys * itemsize               # output buffers
           + 8 * bb_phys * 4)                         # f32 accumulator
    try:
        vmem_cap = int(pltpu.get_tpu_info().vmem_capacity_bytes)
    except Exception:
        vmem_cap = 64 << 20                           # conservative (v7x per-TC)
    vmem_ceiling = (vmem_cap * 3) // 4                # leave compiler headroom
    vmem_limit = int(min(max(2 * est, 16 << 20), vmem_ceiling))

    x_spec_kwargs = {}
    if x_buffers != 2:  # e.g. Buffered(3) on v5e if DMA is still exposed
        x_spec_kwargs["pipeline_mode"] = pl.Buffered(x_buffers)

    if single_k:
        out = pl.pallas_call(
            _lr_kernel_single,
            out_shape=jax.ShapeDtypeStruct((n_bt, 1, bb), out_dtype),
            grid_spec=pltpu.PrefetchScalarGridSpec(
                num_scalar_prefetch=0,
                grid=(n_bt,),
                in_specs=[
                    pl.BlockSpec((bb, F), lambda i: (i, 0), **x_spec_kwargs),
                    # Constant index_map -> weight row fetched once, resident.
                    pl.BlockSpec((1, F), lambda i: (0, 0)),
                    pl.BlockSpec(memory_space=pltpu.MemorySpace.SMEM),
                ],
                out_specs=pl.BlockSpec((1, 1, bb), lambda i: (i, 0, 0)),
            ),
            compiler_params=pltpu.CompilerParams(
                dimension_semantics=("parallel",),
                vmem_limit_bytes=vmem_limit,
            ),
        )(x, w_row, b_smem)
    else:
        if Fp != F:
            # Only the tiny weight row is padded (zeros contribute 0).
            w_row = jnp.pad(w_row, ((0, 0), (0, Fp - F)))
        kern = functools.partial(
            _lr_kernel_multi, feat=F, bf=bf, mask_tail=(F % bf != 0))
        out = pl.pallas_call(
            kern,
            out_shape=jax.ShapeDtypeStruct((n_bt, 1, bb), out_dtype),
            grid_spec=pltpu.PrefetchScalarGridSpec(
                num_scalar_prefetch=0,
                grid=(n_bt, n_kt),
                in_specs=[
                    pl.BlockSpec((bb, bf), lambda i, k: (i, k), **x_spec_kwargs),
                    pl.BlockSpec((1, bf), lambda i, k: (0, k)),
                    pl.BlockSpec(memory_space=pltpu.MemorySpace.SMEM),
                ],
                out_specs=pl.BlockSpec((1, 1, bb), lambda i, k: (i, 0, 0)),
                scratch_shapes=[pltpu.VMEM((1, bb), jnp.float32)],
            ),
            compiler_params=pltpu.CompilerParams(
                dimension_semantics=("parallel", "arbitrary"),
                vmem_limit_bytes=vmem_limit,
            ),
        )(x, w_row, b_smem)

    # (n_bt, 1, bb) lane-dense tiles -> (B, 1), dropping any batch-tail rows.
    return out.reshape(-1, 1)[:B]


if __name__ == "__main__":
    key = jax.random.PRNGKey(0)
    kx, kw, kb, kx2, kw2, kx3, kw3 = jax.random.split(key, 7)

    # Small shapes consistent with the module: LR(feature_num)(x), x:(batch, F).
    batch, feature_num = 8, 32
    bound = 1.0 / (feature_num ** 0.5)
    weight = jax.random.uniform(kw, (1, feature_num), jnp.float32, -bound, bound)
    bias = jax.random.uniform(kb, (1,), jnp.float32, -bound, bound)
    x = jax.random.normal(kx, (batch, feature_num), jnp.float32)

    out = lr_forward(x, weight, bias)
    jax.block_until_ready(out)
    ref = x @ weight.T + bias
    assert out.shape == (batch, 1)
    assert jnp.allclose(out, ref, atol=1e-5, rtol=1e-5)

    # Ragged batch + ragged features, adaptive single-K path (no x padding).
    B2, F2 = 50, 200
    x2 = jax.random.normal(kx2, (B2, F2), jnp.float32)
    w2 = jax.random.uniform(kw2, (1, F2), jnp.float32, -0.1, 0.1)
    out2 = lr_forward(x2, w2, bias)
    jax.block_until_ready(out2)
    ref2 = x2 @ w2.T + bias
    assert out2.shape == (B2, 1)
    assert jnp.allclose(out2, ref2, atol=1e-4, rtol=1e-4)

    # Force the multi-K accumulation path: masked tail feature tile (300 % 128
    # != 0) and a partial tail batch tile (20 % 8 != 0).
    B3, F3 = 20, 300
    x3 = jax.random.normal(kx3, (B3, F3), jnp.float32)
    w3 = jax.random.uniform(kw3, (1, F3), jnp.float32, -0.1, 0.1)
    out3 = lr_forward(x3, w3, bias, block_b=8, block_f=128)
    jax.block_until_ready(out3)
    ref3 = x3 @ w3.T + bias
    assert out3.shape == (B3, 1)
    assert jnp.allclose(out3, ref3, atol=1e-4, rtol=1e-4)

    print("KERNEL_OK")
</pallas_src>

<mosaic_0001>
module attributes {stable_mosaic.version = 11 : i64} {
  func.func @_lr_kernel_single(%arg0: i32, %arg1: memref<8x32xf32, #tpu.memory_space<vmem>>, %arg2: memref<1x32xf32, #tpu.memory_space<vmem>>, %arg3: memref<1xf32, #tpu.memory_space<smem>>, %arg4: memref<1x1x8xf32, #tpu.memory_space<vmem>>) attributes {dimension_semantics = [#tpu.dimension_semantics<parallel>], iteration_bounds = array<i64: 1>, scalar_prefetch = 0 : i64, scratch_operands = 0 : i64, tpu.core_type = #tpu.core_type<tc>, window_params = [{transform_indices = @transform_0, window_bounds = array<i64: 8, 32>}, {pipeline_mode = #tpu.pipeline_mode<synchronous>, transform_indices = @transform_1, window_bounds = array<i64: 1, 32>}, {transform_indices = @transform_2, window_bounds = array<i64: 1>}, {transform_indices = @transform_3, window_bounds = array<i64: 1, 1, 8>}]} {
    %c0 = arith.constant 0 : index
    %c0_0 = arith.constant 0 : index
    %0 = vector.load %arg2[%c0, %c0_0] : memref<1x32xf32, #tpu.memory_space<vmem>>, vector<1x32xf32>
    %c0_1 = arith.constant 0 : index
    %c0_2 = arith.constant 0 : index
    %1 = vector.load %arg1[%c0_1, %c0_2] : memref<8x32xf32, #tpu.memory_space<vmem>>, vector<8x32xf32>
    %cst = arith.constant dense<0.000000e+00> : vector<1x8xf32>
    %2 = tpu.matmul %0, %1, %cst {dimension_numbers = #tpu.dot_dimension_numbers<[1], [1], [0], [0], [0, 0, 1, 0], [], []>} : vector<1x32xf32>, vector<8x32xf32>, vector<1x8xf32> -> vector<1x8xf32>
    %c0_3 = arith.constant 0 : index
    %3 = memref.load %arg3[%c0_3] : memref<1xf32, #tpu.memory_space<smem>>
    %4 = vector.broadcast %3 : f32 to vector<1x8xf32>
    %5 = arith.addf %2, %4 : vector<1x8xf32>
    %c0_4 = arith.constant 0 : index
    %c0_5 = arith.constant 0 : index
    %c0_6 = arith.constant 0 : index
    %6 = vector.load %arg4[%c0_4, %c0_5, %c0_6] : memref<1x1x8xf32, #tpu.memory_space<vmem>>, vector<1x1x8xf32>
    %7 = vector.shape_cast %6 : vector<1x1x8xf32> to vector<1x8xf32>
    %8 = vector.shape_cast %5 : vector<1x8xf32> to vector<1x1x8xf32>
    tpu.vector_store %arg4[%c0_4, %c0_5, %c0_6], %8 {strides = array<i32>} : memref<1x1x8xf32, #tpu.memory_space<vmem>>, vector<1x1x8xf32>,
    return
  }
  func.func @transform_0(%arg0: i32) -> (i32, i32) {
    %c0_i32 = arith.constant 0 : i32
    %c0_i32_0 = arith.constant 0 : i32
    return %arg0, %c0_i32 : i32, i32
  }
  func.func @transform_1(%arg0: i32) -> (i32, i32) {
    %c0_i32 = arith.constant 0 : i32
    %c0_i32_0 = arith.constant 0 : i32
    %c0_i32_1 = arith.constant 0 : i32
    return %c0_i32, %c0_i32_0 : i32, i32
  }
  func.func @transform_2(%arg0: i32) -> i32 {
    %c0_i32 = arith.constant 0 : i32
    %c0_i32_0 = arith.constant 0 : i32
    return %c0_i32 : i32
  }
  func.func @transform_3(%arg0: i32) -> (i32, i32, i32) {
    %c0_i32 = arith.constant 0 : i32
    %c0_i32_0 = arith.constant 0 : i32
    %c0_i32_1 = arith.constant 0 : i32
    return %arg0, %c0_i32, %c0_i32_0 : i32, i32, i32
  }
}

</mosaic_0001>

<bundles_post_ra>
// kernel: lr_forward.1
= control target key start
LH: loop header
LB: loop body
LE: loop exit
PB: predicated region body
PF: predicated region fallthrough
CT: control target
= control target key end

     0   :  { %9 = vsyncpa [#allocation4], 0  ;;  %s219_s0 = inlined_call_operand.hbm [shape: f32[8,32], index: 0, kind: input, shape index: {}]   ;;  %s220_s1 = inlined_call_operand.vmem [shape: f32[1,32], index: 1, kind: input, shape index: {}]   ;;  %s221_s2 = inlined_call_operand.<no memory space> [shape: f32[1], index: 2, kind: input, shape index: {}]   ;;  %s222_s3 = inlined_call_operand.hbm [shape: f32[1,1,8], index: 3, kind: output, shape index: {}]  }
   0x1   :  { %10 = vsyncpa [#allocation5], 0  ;;  %s183_s12 = smov [#allocation3]  }
   0x2   :  { %s17_s13 = sshll.u32 %s183_s12, 4  ;;  %s18_s13 = int_to_ptr.vmem [resolvable:$true] %s17_s13 }
   0x3   :  { %s147_s14 = scalar_lea.vmem %s18_s13, 128  ;;  %p152_p1 = scmp.lt.s32.totalorder %s18_s13, %s18_s13 }
   0x4   :  { %p148_p0 = scmp.ne.s32.totalorder %s18_s13, %s147_s14  ;;  %p153_p2 = scmp.lt.s32.totalorder %s147_s14, %s147_s14 }
   0x6   :  { %p154_p3 = por %p153_p2, %p152_p1 }
   0x8   :  { %p155_p4 = pnand %p154_p3, %p148_p0 }
   0xa   :  { %158 = shalt.err (!%p155_p4)
}
   0xb   :  { %20 = dma.hbm_to_vmem [thread:$0]  %s219_s0, 128, %s18_s13, [#allocation4]  }
   0xc   :  { %179 = dma.done.wait [#allocation4], 128  }
   0xd   :  { %180 = vsyncadd [#allocation4], 4294967168  ;;  %v184_v0 = vmov 0.0   ;;  %vm185_vm0 = vmmov 0   ;;  %vm32_vm1 = vcmask 261120   ;;  %v29_v1 = vld [vmem:[#allocation3] sm:$0xff]  ;;  %v31_v3 = vstv %s221_s2 }
   0xe   :  { %130 = vmatprep.subr.mxu0 %v184_v0  ;;  %132 = vmatprep.mubr.msk.f32.mxu0 %vm185_vm0, %v184_v0  ;;  %v28_v2 = vld [vmem:[%s220_s1] sm:$0x1]  ;;  %s186_s21 = smov [#allocation6]   ;;  %vm109_vm2 = vcmask 57344  }
   0xf   :  { %131 = vmatpush3.xpose.msk.msra.mxu0 %vm32_vm1, %v29_v1  ;;  %s117_s0 = sshll.u32 %s186_s21, 4  ;;  %s118_s0 = int_to_ptr.vmem [resolvable:$true] %s117_s0 }
  0x10   :  { %s159_s22 = scalar_lea.vmem %s118_s0, 16  ;;  %s163_s23 = scalar_lea.vmem %s118_s0, 32 }
  0x11   :  { %p160_p5 = scmp.ne.s32.totalorder %s118_s0, %s159_s22  ;;  %p164_p6 = scmp.lt.s32.totalorder %s118_s0, %s118_s0 }
  0x12   :  { %133 = vmatmul.mubr.msk.f32.vlgmr.msra.gmra.mxu0 %vm32_vm1, %v28_v2  ;;  %p165_p7 = scmp.lt.s32.totalorder %s163_s23, %s159_s22 }
  0x14   :  { %p166_p8 = por %p165_p7, %p164_p6 }
  0x16   :  { %p167_p9 = pnand %p166_p8, %p160_p5 }
  0xd2   :  { %v105_v4 = vpop.f32.mrf.mxu0 }
  0xd3   :  { %v106_v5 = vadd.f32 %v105_v4, %v31_v3 }
  0xd4   :  { %v134_v6 = vpop.f32.mrf.mxu0 }
  0xd5   :  { %110 = vst.msk [vmem:[#allocation6] sm:$0x1] %vm109_vm2, %v106_v5 }
  0xd6   :  { %170 = shalt.err (!%p167_p9)
}
  0xd7   :  { %120 = dma.vmem_to_hbm [thread:$0]  %s118_s0, 16, %s222_s3, [#allocation5]  }
  0xd8   :  { %181 = dma.done.wait [#allocation5], 16  }
  0xd9   :  { %182 = vsyncadd [#allocation5], 4294967280 }
  0xda   :  { %124 = vsyncpa [#allocation4], 1 }
  0xdb   :  { %125 = vsyncpa [#allocation5], 1 }

</bundles_post_ra>
